<compile_context>
chip_gen: v6e
topology: v6e:2x2x1
jax: 0.10.0
libtpu: 0.0.40
codegen_flags: <defaults>
</compile_context>

<pallas_src>
import jax
import jax.numpy as jnp
from jax.experimental import pallas as pl
from jax.experimental.pallas import tpu as pltpu


def _poly5_kernel(p_ref, x_ref, o_ref):
    # p_ref: SMEM (6,) f32 scalars [a, b, c, d, e, f]
    # x_ref / o_ref: VMEM tile of the flattened, lane-dense input
    x = x_ref[...].astype(jnp.float32)
    a, b, c, d, e, f = (p_ref[i] for i in range(6))
    # Horner: y = x*(a + x*(b + x*(c + x*(d + x*e)))) + f
    y = x * (a + x * (b + x * (c + x * (d + x * e)))) + f
    o_ref[...] = y.astype(o_ref.dtype)


def _poly5_ref(x, p):
    # Single fused XLA pass; used for tiny / awkwardly-sized inputs.
    xf = x.astype(jnp.float32)
    y = xf * (p[0] + xf * (p[1] + xf * (p[2] + xf * (p[3] + xf * p[4])))) + p[5]
    return y.astype(x.dtype)


def polynomial5(x, params, *, block_bytes=4 * 1024 * 1024):
    """x: any-shape array (e.g. NCHW). params: [a, b, c, d, e, f] (shape (6,) or (6,1))."""
    params = jnp.asarray(params, jnp.float32).reshape(-1)

    orig_shape = x.shape
    out_dtype = x.dtype
    total = x.size
    itemsize = jnp.dtype(out_dtype).itemsize
    # dtype-aware sublane packing (f32: 8, bf16/fp16: 16, int8/fp8: 32)
    sublane = {4: 8, 2: 16, 1: 32}.get(itemsize, 8)

    # Lane-dense width that exactly divides the element count, with a
    # sublane-aligned row count -> reshape is free, no pad / slice HBM passes.
    cols = 0
    for cand in (1024, 512, 256, 128):
        if total % cand == 0 and (total // cand) % sublane == 0:
            cols = cand
            break

    # Tiny or awkward sizes: plain XLA elementwise is already optimal.
    if cols == 0 or total < sublane * 128:
        return _poly5_ref(x, params)

    rows = total // cols
    x2d = x.reshape(rows, cols)  # contiguous reshape: no copy

    # Tile rows targeting ~block_bytes per block, as an exact divisor of rows.
    tr_target = max(sublane, (block_bytes // (cols * itemsize)) // sublane * sublane)
    tr = min(tr_target, rows)
    tr_floor = max(sublane, min(tr, 256))  # don't shrink into tiny, overhead-bound tiles
    while tr >= tr_floor and rows % tr != 0:
        tr -= sublane
    if tr < tr_floor or rows % tr != 0:
        # No convenient divisor near the target tile size; a fused XLA pass is
        # still at the HBM roofline for this elementwise op.
        return _poly5_ref(x, params)
    grid_len = rows // tr

    # Balance the "parallel" axis across v7x's two TensorCores: prefer an even
    # number of grid steps (harmless on 1-TC v5e/v6e).
    if grid_len > 1 and grid_len % 2 == 1 and tr % (2 * sublane) == 0:
        tr //= 2
        grid_len *= 2

    out = pl.pallas_call(
        _poly5_kernel,
        out_shape=jax.ShapeDtypeStruct((rows, cols), out_dtype),
        grid_spec=pltpu.PrefetchScalarGridSpec(
            num_scalar_prefetch=0,
            grid=(grid_len,),
            in_specs=[
                pl.BlockSpec(memory_space=pltpu.MemorySpace.SMEM),  # params (6,)
                pl.BlockSpec((tr, cols), lambda i: (i, 0)),
            ],
            out_specs=pl.BlockSpec((tr, cols), lambda i: (i, 0)),
        ),
        compiler_params=pltpu.CompilerParams(
            dimension_semantics=("parallel",),
            # Explicit limit so ~4 MiB double-buffered in+out also fits v5e's
            # 16 MiB scoped default; equals the v6e/v7x default.
            vmem_limit_bytes=32 * 1024 * 1024,
        ),
    )(params, x2d)

    return out.reshape(orig_shape)  # contiguous reshape: no copy


if __name__ == "__main__":
    key = jax.random.PRNGKey(0)
    kx, kp = jax.random.split(key)

    # Deterministic "randn(1)" parameters a..f (matches __init__ shapes).
    params = jax.random.normal(kp, (6,), dtype=jnp.float32)

    def reference(x):
        a, b, c, d, e, f = (params[i] for i in range(6))
        return a * x + b * x**2 + c * x**3 + d * x**4 + e * x**5 + f

    # 1) Small NCHW input (2*4*16*16 = 2048 elems -> single (8, 256) block).
    x = jax.random.normal(kx, (2, 4, 16, 16), dtype=jnp.float32)
    y = polynomial5(x, params)
    jax.block_until_ready(y)
    assert jnp.allclose(y, reference(x), atol=1e-5, rtol=1e-5), "mismatch (small)"

    # 2) Larger input with a reduced block size to exercise the multi-step
    #    pipelined grid (rows=512, cols=1024, tr=256 -> 2 grid steps).
    x2 = jax.random.normal(kx, (4, 32, 64, 64), dtype=jnp.float32)
    y2 = polynomial5(x2, params, block_bytes=1 << 20)
    jax.block_until_ready(y2)
    assert jnp.allclose(y2, reference(x2), atol=1e-4, rtol=1e-4), "mismatch (large)"

    # 3) Awkward size -> fused-XLA fallback path (no pad/slice HBM passes).
    x3 = jax.random.normal(kx, (3, 5, 7), dtype=jnp.float32)
    y3 = polynomial5(x3, params)
    jax.block_until_ready(y3)
    assert jnp.allclose(y3, reference(x3), atol=1e-5, rtol=1e-5), "mismatch (fallback)"

    print("KERNEL_OK")
</pallas_src>

<mosaic_0001>
module attributes {stable_mosaic.version = 11 : i64} {
  func.func @_poly5_kernel(%arg0: i32, %arg1: memref<6xf32, #tpu.memory_space<smem>>, %arg2: memref<8x256xf32, #tpu.memory_space<vmem>>, %arg3: memref<8x256xf32, #tpu.memory_space<vmem>>) attributes {dimension_semantics = [#tpu.dimension_semantics<parallel>], iteration_bounds = array<i64: 1>, scalar_prefetch = 0 : i64, scratch_operands = 0 : i64, tpu.core_type = #tpu.core_type<tc>, window_params = [{transform_indices = @transform_0, window_bounds = array<i64: 6>}, {transform_indices = @transform_1, window_bounds = array<i64: 8, 256>}, {transform_indices = @transform_2, window_bounds = array<i64: 8, 256>}]} {
    %c0 = arith.constant 0 : index
    %c0_0 = arith.constant 0 : index
    %0 = vector.load %arg2[%c0, %c0_0] : memref<8x256xf32, #tpu.memory_space<vmem>>, vector<8x256xf32>
    %c0_1 = arith.constant 0 : index
    %1 = memref.load %arg1[%c0_1] : memref<6xf32, #tpu.memory_space<smem>>
    %c1 = arith.constant 1 : index
    %2 = memref.load %arg1[%c1] : memref<6xf32, #tpu.memory_space<smem>>
    %c2 = arith.constant 2 : index
    %3 = memref.load %arg1[%c2] : memref<6xf32, #tpu.memory_space<smem>>
    %c3 = arith.constant 3 : index
    %4 = memref.load %arg1[%c3] : memref<6xf32, #tpu.memory_space<smem>>
    %c4 = arith.constant 4 : index
    %5 = memref.load %arg1[%c4] : memref<6xf32, #tpu.memory_space<smem>>
    %c5 = arith.constant 5 : index
    %6 = memref.load %arg1[%c5] : memref<6xf32, #tpu.memory_space<smem>>
    %7 = vector.broadcast %5 : f32 to vector<8x256xf32>
    %8 = arith.mulf %0, %7 : vector<8x256xf32>
    %9 = vector.broadcast %4 : f32 to vector<8x256xf32>
    %10 = arith.addf %9, %8 : vector<8x256xf32>
    %11 = arith.mulf %0, %10 : vector<8x256xf32>
    %12 = vector.broadcast %3 : f32 to vector<8x256xf32>
    %13 = arith.addf %12, %11 : vector<8x256xf32>
    %14 = arith.mulf %0, %13 : vector<8x256xf32>
    %15 = vector.broadcast %2 : f32 to vector<8x256xf32>
    %16 = arith.addf %15, %14 : vector<8x256xf32>
    %17 = arith.mulf %0, %16 : vector<8x256xf32>
    %18 = vector.broadcast %1 : f32 to vector<8x256xf32>
    %19 = arith.addf %18, %17 : vector<8x256xf32>
    %20 = arith.mulf %0, %19 : vector<8x256xf32>
    %21 = vector.broadcast %6 : f32 to vector<8x256xf32>
    %22 = arith.addf %20, %21 : vector<8x256xf32>
    %c0_2 = arith.constant 0 : index
    %c0_3 = arith.constant 0 : index
    %23 = vector.load %arg3[%c0_2, %c0_3] : memref<8x256xf32, #tpu.memory_space<vmem>>, vector<8x256xf32>
    tpu.vector_store %arg3[%c0_2, %c0_3], %22 {strides = array<i32>} : memref<8x256xf32, #tpu.memory_space<vmem>>, vector<8x256xf32>,
    return
  }
  func.func @transform_0(%arg0: i32) -> i32 {
    %c0_i32 = arith.constant 0 : i32
    %c0_i32_0 = arith.constant 0 : i32
    return %c0_i32 : i32
  }
  func.func @transform_1(%arg0: i32) -> (i32, i32) {
    %c0_i32 = arith.constant 0 : i32
    %c0_i32_0 = arith.constant 0 : i32
    return %arg0, %c0_i32 : i32, i32
  }
  func.func @transform_2(%arg0: i32) -> (i32, i32) {
    %c0_i32 = arith.constant 0 : i32
    %c0_i32_0 = arith.constant 0 : i32
    return %arg0, %c0_i32 : i32, i32
  }
}

</mosaic_0001>

<bundles_post_ra>
// kernel: tpu_custom_call.1
= control target key start
LH: loop header
LB: loop body
LE: loop exit
PB: predicated region body
PF: predicated region fallthrough
CT: control target
= control target key end

     0   :  { %7 = vsyncpa [#allocation5], 0  ;;  %s176_s0 = inlined_call_operand.hbm [shape: f32[6], index: 0, kind: input, shape index: {}]   ;;  %s177_s1 = inlined_call_operand.hbm [shape: f32[8,256], index: 1, kind: input, shape index: {}]   ;;  %s178_s2 = inlined_call_operand.hbm [shape: f32[8,256], index: 2, kind: output, shape index: {}]  }
   0x1   :  { %8 = vsyncpa [#allocation3], 0 }
   0x2   :  { %9 = vsyncpa [#allocation4], 0  ;;  %s149_s9 = smov [#allocation2]   ;;  %s150_s12 = smov [#allocation6]  }
   0x3   :  { %17 = dma.hbm_to_smem %s176_s0, 16, %s149_s9, [#allocation5]  }
   0x4   :  { %s24_s13 = sshll.u32 %s150_s12, 4  ;;  %s25_s13 = int_to_ptr.vmem [resolvable:$true] %s24_s13 }
   0x5   :  { %s111_s14 = scalar_lea.vmem %s25_s13, 256  ;;  %p116_p1 = scmp.lt.s32.totalorder %s25_s13, %s25_s13 }
   0x6   :  { %p112_p0 = scmp.ne.s32.totalorder %s25_s13, %s111_s14  ;;  %p117_p2 = scmp.lt.s32.totalorder %s111_s14, %s111_s14 }
   0x8   :  { %p118_p3 = por %p117_p2, %p116_p1 }
   0xa   :  { %p119_p4 = pnand %p118_p3, %p112_p0 }
   0xc   :  { %122 = shalt.err (!%p119_p4)
}
   0xd   :  { %27 = dma.hbm_to_vmem [thread:$0]  %s177_s1, 256, %s25_s13, [#allocation3]  }
   0xe   :  { %143 = dma.done.wait [#allocation5], 16  }
   0xf   :  { %144 = vsyncadd [#allocation5], 4294967280 }
  0x10   :  { %145 = dma.done.wait [#allocation3], 256  }
  0x11   :  { %146 = vsyncadd [#allocation3], 4294967040 }
  0x12   :  { %34 = sfence }
  0x13   :  { %s89_s0 = sld [smem:[#allocation2 + $0x3]]  ;;  %v35_v0 = vld [vmem:[#allocation6] sm:$0xff]  ;;  %v36_v1 = vld [vmem:[#allocation6 + $0x8] sm:$0xff]  ;;  %s151_s21 = smov [#allocation7]  }
  0x14   :  { %s90_s17 = sld [smem:[#allocation2 + $0x4]]  ;;  %s77_s22 = sshll.u32 %s151_s21, 4  ;;  %s78_s22 = int_to_ptr.vmem [resolvable:$true] %s77_s22 }
  0x15   :  { %s88_s18 = sld [smem:[#allocation2 + $0x2]]  ;;  %s123_s23 = scalar_lea.vmem %s78_s22, 256 }
  0x16   :  { %s87_s19 = sld [smem:[#allocation2 + $0x1]]  ;;  %p124_p5 = scmp.ne.s32.totalorder %s78_s22, %s123_s23 }
  0x17   :  { %s37_s20 = sld [smem:[#allocation2]]  ;;  %p128_p6 = scmp.lt.s32.totalorder %s78_s22, %s78_s22 }
  0x18   :  { %s91_s1 = sld [smem:[#allocation2 + $0x5]]  ;;  %p129_p7 = scmp.lt.s32.totalorder %s123_s23, %s123_s23 }
  0x19   :  { %v46_v3 = vstv %s89_s0 }
  0x1a   :  { %v43_v2 = vstv %s90_s17  ;;  %p130_p8 = por %p129_p7, %p128_p6 }
  0x1b   :  { %v44_v4 = vmul.f32 %v43_v2, %v35_v0  ;;  %v45_v5 = vmul.f32 %v43_v2, %v36_v1  ;;  %v51_v8 = vstv %s88_s18 }
  0x1c   :  { %v56_v13 = vstv %s87_s19  ;;  %p131_p9 = pnand %p130_p8, %p124_p5 }
  0x1d   :  { %v47_v6 = vadd.f32 %v46_v3, %v44_v4  ;;  %v48_v7 = vadd.f32 %v46_v3, %v45_v5  ;;  %v61_v18 = vstv %s37_s20 }
  0x1e   :  { %v66_v23 = vstv %s91_s1 }
  0x1f   :  { %v49_v9 = vmul.f32 %v47_v6, %v35_v0  ;;  %v50_v10 = vmul.f32 %v48_v7, %v36_v1 }
  0x21   :  { %v52_v11 = vadd.f32 %v51_v8, %v49_v9  ;;  %v53_v12 = vadd.f32 %v51_v8, %v50_v10 }
  0x23   :  { %v54_v14 = vmul.f32 %v52_v11, %v35_v0  ;;  %v55_v15 = vmul.f32 %v53_v12, %v36_v1 }
  0x25   :  { %v57_v16 = vadd.f32 %v56_v13, %v54_v14  ;;  %v58_v17 = vadd.f32 %v56_v13, %v55_v15 }
  0x27   :  { %v59_v19 = vmul.f32 %v57_v16, %v35_v0  ;;  %v60_v20 = vmul.f32 %v58_v17, %v36_v1 }
  0x29   :  { %v62_v21 = vadd.f32 %v61_v18, %v59_v19  ;;  %v63_v22 = vadd.f32 %v61_v18, %v60_v20 }
  0x2b   :  { %v64_v24 = vmul.f32 %v62_v21, %v35_v0  ;;  %v65_v25 = vmul.f32 %v63_v22, %v36_v1 }
  0x2d   :  { %v67_v26 = vadd.f32 %v66_v23, %v64_v24  ;;  %v68_v27 = vadd.f32 %v66_v23, %v65_v25 }
  0x2f   :  { %69 = vst [vmem:[#allocation7] sm:$0xff] %v67_v26  ;;  %70 = vst [vmem:[#allocation7 + $0x8] sm:$0xff] %v68_v27 }
  0x30   :  { %134 = shalt.err (!%p131_p9)
}
  0x31   :  { %80 = dma.vmem_to_hbm [thread:$0]  %s78_s22, 256, %s178_s2, [#allocation4]  }
  0x32   :  { %147 = dma.done.wait [#allocation4], 256  }
  0x33   :  { %148 = vsyncadd [#allocation4], 4294967040 }
  0x34   :  { %84 = vsyncpa [#allocation3], 1 }
  0x35   :  { %85 = vsyncpa [#allocation4], 1 }
  0x36   :  { %86 = vsyncpa [#allocation5], 1 }

</bundles_post_ra>
